<compile_context>
chip_gen: v6e
topology: v6e:2x2x1
jax: 0.10.0
libtpu: 0.0.40
codegen_flags: <defaults>
</compile_context>

<pallas_src>
import functools

import jax
import jax.numpy as jnp
import numpy as np
from jax.experimental import pallas as pl
from jax.experimental.pallas import tpu as pltpu


def _round_up(n, m):
    return ((n + m - 1) // m) * m


def _nn_node_kernel(x_ref, w_ref, b_ref, *rest, dropout_rate, apply_dropout):
    """x_ref: [TB, Fp]  w_ref: [Fp, Dp]  b_ref: [1, Dp] (f32)
       optional bits_ref: [TB, Dp] int32 uniform in [0, 2^24)
       o_ref: [TB, Dp] (f32)."""
    o_ref = rest[-1]

    # MXU matmul with f32 accumulation; operands may be bf16.
    z = jnp.dot(x_ref[...], w_ref[...], preferred_element_type=jnp.float32)
    z = z + b_ref[...]            # bias broadcast over rows (f32)
    y = jnp.tanh(z)               # EUP transcendental, f32

    if apply_dropout and dropout_rate > 0.0:
        bits_ref = rest[0]
        keep_prob = 1.0 - float(dropout_rate)
        thresh = jnp.int32(int(keep_prob * float(1 << 24)))
        inv_keep = jnp.float32(1.0 / keep_prob)
        # One fused select: keep -> scale by 1/keep_prob, drop -> 0.
        y = jnp.where(bits_ref[...] < thresh, y * inv_keep, jnp.float32(0.0))

    o_ref[...] = y.astype(o_ref.dtype)


def init_nn_node_params(key, d_in, d_out, cat_size_list):
    """Deterministic parameter init mirroring the PyTorch module's shapes."""
    keys = jax.random.split(key, 2 + len(cat_size_list))
    embeddings = []
    latent_cols = []
    for i, el in enumerate(cat_size_list):
        col_size = el // 2 + 2
        latent_cols.append(col_size)
        # torch.nn.Embedding default init: N(0, 1)
        embeddings.append(jax.random.normal(keys[i], (el, col_size), jnp.float32))
    f_in = d_in + sum(latent_cols)
    k = 1.0 / np.sqrt(f_in)
    # torch.nn.Linear default init: U(-1/sqrt(fan_in), 1/sqrt(fan_in))
    w = jax.random.uniform(keys[-2], (f_in, d_out), jnp.float32, -k, k)  # pre-transposed [F, D]
    b = jax.random.uniform(keys[-1], (d_out,), jnp.float32, -k, k)
    return {"embeddings": embeddings, "w": w, "b": b}


def nn_node_forward(X, x_cat, params, *, dropout_rate=0.1, training=False,
                    rng_key=None, block_rows=512, mxu_dtype=jnp.bfloat16):
    # --- glue: embedding lookups + concat (plain JAX) ---
    feats = [X.astype(jnp.float32)]
    if x_cat is not None:
        for i, emb in enumerate(params["embeddings"]):
            feats.append(jnp.take(emb, x_cat[:, i], axis=0))
    Xc = jnp.concatenate(feats, axis=1)

    W = params["w"]                           # [F, D]
    b = params["b"]                           # [D]
    B, F = Xc.shape
    D = W.shape[1]

    # --- padding: lane-dense K (F) and N (D), sublane-aligned batch tile ---
    F_pad = _round_up(F, 128)
    D_pad = _round_up(D, 128)
    TB = min(block_rows, _round_up(B, 8))     # batch tile (multiple of 8)
    B_pad = _round_up(B, TB)

    Xc_p = jnp.pad(Xc.astype(mxu_dtype), ((0, B_pad - B), (0, F_pad - F)))
    W_p = jnp.pad(W.astype(mxu_dtype), ((0, F_pad - F), (0, D_pad - D)))
    b_p = jnp.pad(b.astype(jnp.float32), (0, D_pad - D)).reshape(1, D_pad)

    apply_dropout = bool(training) and dropout_rate > 0.0

    args = [Xc_p, W_p, b_p]
    in_specs = [
        pl.BlockSpec((TB, F_pad), lambda i: (i, 0)),        # X_cat row tile
        pl.BlockSpec((F_pad, D_pad), lambda i: (0, 0)),     # W (resident)
        pl.BlockSpec((1, D_pad), lambda i: (0, 0)),         # bias (resident)
    ]
    if apply_dropout:
        if rng_key is None:
            rng_key = jax.random.PRNGKey(0)
        # Uniform ints in [0, 2^24); each batch tile reads its own rows, so the
        # dropout mask is independent across grid steps.
        bits = jax.random.randint(rng_key, (B_pad, D_pad), 0, 1 << 24,
                                  dtype=jnp.int32)
        args.append(bits)
        in_specs.append(pl.BlockSpec((TB, D_pad), lambda i: (i, 0)))

    kernel = functools.partial(_nn_node_kernel,
                               dropout_rate=dropout_rate,
                               apply_dropout=apply_dropout)

    out_padded = pl.pallas_call(
        kernel,
        out_shape=jax.ShapeDtypeStruct((B_pad, D_pad), jnp.float32),
        grid=(B_pad // TB,),
        in_specs=in_specs,
        out_specs=pl.BlockSpec((TB, D_pad), lambda i: (i, 0)),
        compiler_params=pltpu.CompilerParams(
            dimension_semantics=("parallel",),
            vmem_limit_bytes=32 * 1024 * 1024),
    )(*args)

    return out_padded[:B, :D]


if __name__ == "__main__":
    # Small shapes consistent with the module:
    batch = 8
    d_in = 16
    d_out = 32
    cat_size_list = [5, 7]        # -> embedding dims 4 and 5, total F = 16+4+5 = 25

    key = jax.random.PRNGKey(0)
    k_par, k_x, k_cat0, k_cat1 = jax.random.split(key, 4)

    params = init_nn_node_params(k_par, d_in, d_out, cat_size_list)

    X = jax.random.normal(k_x, (batch, d_in), jnp.float32)
    x_cat = jnp.stack(
        [jax.random.randint(k_cat0, (batch,), 0, cat_size_list[0]),
         jax.random.randint(k_cat1, (batch,), 0, cat_size_list[1])],
        axis=1).astype(jnp.int32)

    # Plain-JAX reference (f32).
    feats = [X] + [jnp.take(params["embeddings"][i], x_cat[:, i], axis=0)
                   for i in range(len(cat_size_list))]
    Xc = jnp.concatenate(feats, axis=1)
    ref = jnp.tanh(Xc @ params["w"] + params["b"][None, :])

    # Eval-mode, f32 MXU operands: exact check.
    out_f32 = jax.block_until_ready(
        nn_node_forward(X, x_cat, params, training=False, mxu_dtype=jnp.float32))
    assert out_f32.shape == (batch, d_out)
    assert np.allclose(np.asarray(out_f32), np.asarray(ref), atol=1e-5), \
        "f32 kernel mismatch vs reference"

    # Eval-mode, default bf16 MXU operands (v6e/v7x fast path): loose tolerance.
    out_bf16 = jax.block_until_ready(
        nn_node_forward(X, x_cat, params, training=False))
    assert np.allclose(np.asarray(out_bf16), np.asarray(ref),
                       atol=3e-2, rtol=3e-2), "bf16 kernel mismatch vs reference"

    # Train-mode: dropout mask applied in-kernel (Bernoulli keep ~ 0.9).
    # TODO(synk): dropout mask pattern cannot match torch's RNG stream exactly.
    out_train = jax.block_until_ready(
        nn_node_forward(X, x_cat, params, dropout_rate=0.1, training=True,
                        rng_key=jax.random.PRNGKey(1234)))
    assert out_train.shape == (batch, d_out)
    assert np.all(np.isfinite(np.asarray(out_train)))
    kept_frac = float(np.mean(np.abs(np.asarray(out_train)) > 0.0))
    assert 0.5 < kept_frac <= 1.0, f"unexpected dropout keep fraction {kept_frac}"

    print("KERNEL_OK")
</pallas_src>

<mosaic_0001>
module attributes {stable_mosaic.version = 11 : i64} {
  func.func @_nn_node_kernel(%arg0: i32, %arg1: memref<8x128xf32, #tpu.memory_space<vmem>>, %arg2: memref<128x128xf32, #tpu.memory_space<vmem>>, %arg3: memref<1x128xf32, #tpu.memory_space<vmem>>, %arg4: memref<8x128xf32, #tpu.memory_space<vmem>>) attributes {dimension_semantics = [#tpu.dimension_semantics<parallel>], iteration_bounds = array<i64: 1>, scalar_prefetch = 0 : i64, scratch_operands = 0 : i64, tpu.core_type = #tpu.core_type<tc>, window_params = [{transform_indices = @transform_0, window_bounds = array<i64: 8, 128>}, {pipeline_mode = #tpu.pipeline_mode<synchronous>, transform_indices = @transform_1, window_bounds = array<i64: 128, 128>}, {pipeline_mode = #tpu.pipeline_mode<synchronous>, transform_indices = @transform_2, window_bounds = array<i64: 1, 128>}, {transform_indices = @transform_3, window_bounds = array<i64: 8, 128>}]} {
    %c0 = arith.constant 0 : index
    %c0_0 = arith.constant 0 : index
    %0 = vector.load %arg1[%c0, %c0_0] : memref<8x128xf32, #tpu.memory_space<vmem>>, vector<8x128xf32>
    %c0_1 = arith.constant 0 : index
    %c0_2 = arith.constant 0 : index
    %1 = vector.load %arg2[%c0_1, %c0_2] : memref<128x128xf32, #tpu.memory_space<vmem>>, vector<128x128xf32>
    %cst = arith.constant dense<0.000000e+00> : vector<8x128xf32>
    %2 = tpu.matmul %0, %1, %cst {dimension_numbers = #tpu.dot_dimension_numbers<[1], [0], [0], [1], [0, 0, 1, 1], [], []>} : vector<8x128xf32>, vector<128x128xf32>, vector<8x128xf32> -> vector<8x128xf32>
    %c0_3 = arith.constant 0 : index
    %c0_4 = arith.constant 0 : index
    %3 = vector.load %arg3[%c0_3, %c0_4] : memref<1x128xf32, #tpu.memory_space<vmem>>, vector<1x128xf32>
    %4 = vector.broadcast %3 : vector<1x128xf32> to vector<8x128xf32>
    %5 = arith.addf %2, %4 : vector<8x128xf32>
    %6 = math.tanh %5 : vector<8x128xf32>
    %c0_5 = arith.constant 0 : index
    %c0_6 = arith.constant 0 : index
    %7 = vector.load %arg4[%c0_5, %c0_6] : memref<8x128xf32, #tpu.memory_space<vmem>>, vector<8x128xf32>
    tpu.vector_store %arg4[%c0_5, %c0_6], %6 {strides = array<i32>} : memref<8x128xf32, #tpu.memory_space<vmem>>, vector<8x128xf32>,
    return
  }
  func.func @transform_0(%arg0: i32) -> (i32, i32) {
    %c0_i32 = arith.constant 0 : i32
    %c0_i32_0 = arith.constant 0 : i32
    return %arg0, %c0_i32 : i32, i32
  }
  func.func @transform_1(%arg0: i32) -> (i32, i32) {
    %c0_i32 = arith.constant 0 : i32
    %c0_i32_0 = arith.constant 0 : i32
    %c0_i32_1 = arith.constant 0 : i32
    return %c0_i32, %c0_i32_0 : i32, i32
  }
  func.func @transform_2(%arg0: i32) -> (i32, i32) {
    %c0_i32 = arith.constant 0 : i32
    %c0_i32_0 = arith.constant 0 : i32
    %c0_i32_1 = arith.constant 0 : i32
    return %c0_i32, %c0_i32_0 : i32, i32
  }
  func.func @transform_3(%arg0: i32) -> (i32, i32) {
    %c0_i32 = arith.constant 0 : i32
    %c0_i32_0 = arith.constant 0 : i32
    return %arg0, %c0_i32 : i32, i32
  }
}

</mosaic_0001>

<bundles_post_ra>
// kernel: tpu_custom_call.1
= control target key start
LH: loop header
LB: loop body
LE: loop exit
PB: predicated region body
PF: predicated region fallthrough
CT: control target
= control target key end

     0   :  { %8 = vsyncpa [#allocation3], 0  ;;  %s320_s0 = inlined_call_operand.hbm [shape: f32[8,128], index: 0, kind: input, shape index: {}]   ;;  %s321_s1 = inlined_call_operand.hbm [shape: f32[128,128], index: 1, kind: input, shape index: {}]   ;;  %s322_s2 = inlined_call_operand.vmem [shape: f32[1,128], index: 2, kind: input, shape index: {}]   ;;  %s323_s3 = inlined_call_operand.hbm [shape: f32[8,128], index: 3, kind: output, shape index: {}]  }
   0x1   :  { %9 = vsyncpa [#allocation6], 0 }
   0x2   :  { %10 = vsyncpa [#allocation4], 0  ;;  %s281_s12 = smov [#allocation2]   ;;  %s282_s14 = smov [#allocation5]  }
   0x3   :  { %s17_s13 = sshll.u32 %s281_s12, 4  ;;  %s26_s15 = sshll.u32 %s282_s14, 4  ;;  %s18_s13 = int_to_ptr.vmem [resolvable:$true] %s17_s13  ;;  %s27_s15 = int_to_ptr.vmem [resolvable:$true] %s26_s15 }
   0x4   :  { %s223_s16 = scalar_lea.vmem %s18_s13, 128  ;;  %p228_p1 = scmp.lt.s32.totalorder %s18_s13, %s18_s13 }
   0x5   :  { %p224_p0 = scmp.ne.s32.totalorder %s18_s13, %s223_s16  ;;  %p229_p2 = scmp.lt.s32.totalorder %s223_s16, %s223_s16 }
   0x7   :  { %p230_p3 = por %p229_p2, %p228_p1 }
   0x9   :  { %p231_p4 = pnand %p230_p3, %p224_p0 }
   0xb   :  { %234 = shalt.err (!%p231_p4)
}
   0xc   :  { %20 = dma.hbm_to_vmem [thread:$0]  %s320_s0, 128, %s18_s13, [#allocation3]  }
   0xd   :  { %s243_s19 = scalar_lea.vmem %s27_s15, 2048  ;;  %p248_p6 = scmp.lt.s32.totalorder %s27_s15, %s27_s15 }
   0xe   :  { %p244_p5 = scmp.ne.s32.totalorder %s27_s15, %s243_s19  ;;  %p249_p7 = scmp.lt.s32.totalorder %s243_s19, %s243_s19 }
  0x10   :  { %p250_p8 = por %p249_p7, %p248_p6 }
  0x12   :  { %p251_p9 = pnand %p250_p8, %p244_p5 }
  0x14   :  { %254 = shalt.err (!%p251_p9)
}
  0x15   :  { %s283_s20 = smov 128   ;;  %s284_s21 = smov 8  }
  0x16   :  { %32 = dma.hbm_to_vmem [thread:$0]  %s321_s1, 2048, %s27_s15, [#allocation6], %s283_s20, %s283_s20, %s284_s21  }
  0x17   :  { %275 = dma.done.wait [#allocation3], 128  }
  0x18   :  { %276 = vsyncadd [#allocation3], 4294967168 }
  0x19   :  { %277 = dma.done.wait [#allocation6], 2048  }
  0x1a   :  { %278 = vsyncadd [#allocation6], 4294965248  ;;  %v285_v0 = vmov 0.0   ;;  %vm286_vm0 = vmmov 0   ;;  %v57_v1 = vld [vmem:[#allocation5 + $0x78] sm:$0xff]  ;;  %v56_v2 = vld [vmem:[#allocation5 + $0x70] sm:$0xff] }
  0x1b   :  { %171 = vmatprep.subr.mxu0 %v285_v0  ;;  %203 = vmatprep.mubr.msk.f32.mxu0 %vm286_vm0, %v285_v0  ;;  %v55_v3 = vld [vmem:[#allocation5 + $0x68] sm:$0xff]  ;;  %v54_v4 = vld [vmem:[#allocation5 + $0x60] sm:$0xff]  ;;  %v53_v5 = vld [vmem:[#allocation5 + $0x58] sm:$0xff]  ;;  %s287_s24 = smov [#allocation7]  }
  0x1c   :  { %172 = vmatpush3.msra.mxu0 %v57_v1  ;;  %v52_v6 = vld [vmem:[#allocation5 + $0x50] sm:$0xff]  ;;  %v51_v7 = vld [vmem:[#allocation5 + $0x48] sm:$0xff]  ;;  %v50_v8 = vld [vmem:[#allocation5 + $0x40] sm:$0xff]  ;;  %s143_s25 = sshll.u32 %s287_s24, 4  ;;  %s144_s25 = int_to_ptr.vmem [resolvable:$true] %s143_s25 }
  0x1d   :  { %173 = vmatprep.subr.mxu0 %v285_v0  ;;  %v49_v9 = vld [vmem:[#allocation5 + $0x38] sm:$0xff]  ;;  %v48_v10 = vld [vmem:[#allocation5 + $0x30] sm:$0xff]  ;;  %v47_v11 = vld [vmem:[#allocation5 + $0x28] sm:$0xff]  ;;  %s255_s26 = scalar_lea.vmem %s144_s25, 128  ;;  %p260_p11 = scmp.lt.s32.totalorder %s144_s25, %s144_s25 }
  0x1e   :  { %174 = vmatpush3.msra.mxu0 %v56_v2  ;;  %v46_v12 = vld [vmem:[#allocation5 + $0x20] sm:$0xff]  ;;  %v45_v13 = vld [vmem:[#allocation5 + $0x18] sm:$0xff]  ;;  %v44_v14 = vld [vmem:[#allocation5 + $0x10] sm:$0xff]  ;;  %p256_p10 = scmp.ne.s32.totalorder %s144_s25, %s255_s26  ;;  %p261_p12 = scmp.lt.s32.totalorder %s255_s26, %s255_s26 }
  0x1f   :  { %175 = vmatprep.subr.mxu0 %v285_v0  ;;  %v43_v15 = vld [vmem:[#allocation5 + $0x8] sm:$0xff]  ;;  %v42_v16 = vld [vmem:[#allocation5] sm:$0xff]  ;;  %v41_v17 = vld [vmem:[#allocation2] sm:$0xff] }
  0x20   :  { %176 = vmatpush3.msra.mxu0 %v55_v3  ;;  %v153_v18 = vld [vmem:[%s322_s2] ss:$0 sm:$0xff]  ;;  %p262_p13 = por %p261_p12, %p260_p11 }
  0x21   :  { %177 = vmatprep.subr.mxu0 %v285_v0 }
  0x22   :  { %178 = vmatpush3.msra.mxu0 %v54_v4  ;;  %p263_p0 = pnand %p262_p13, %p256_p10 }
  0x23   :  { %179 = vmatprep.subr.mxu0 %v285_v0 }
  0x24   :  { %180 = vmatpush3.msra.mxu0 %v53_v5 }
  0x25   :  { %181 = vmatprep.subr.mxu0 %v285_v0 }
  0x26   :  { %182 = vmatpush3.msra.mxu0 %v52_v6 }
  0x27   :  { %183 = vmatprep.subr.mxu0 %v285_v0 }
  0x28   :  { %184 = vmatpush3.msra.mxu0 %v51_v7 }
  0x29   :  { %185 = vmatprep.subr.mxu0 %v285_v0 }
  0x2a   :  { %186 = vmatpush3.msra.mxu0 %v50_v8 }
  0x2b   :  { %187 = vmatprep.subr.mxu0 %v285_v0 }
  0x2c   :  { %188 = vmatpush3.msra.mxu0 %v49_v9 }
  0x2d   :  { %189 = vmatprep.subr.mxu0 %v285_v0 }
  0x2e   :  { %190 = vmatpush3.msra.mxu0 %v48_v10 }
  0x2f   :  { %191 = vmatprep.subr.mxu0 %v285_v0 }
  0x30   :  { %192 = vmatpush3.msra.mxu0 %v47_v11 }
  0x31   :  { %193 = vmatprep.subr.mxu0 %v285_v0 }
  0x32   :  { %194 = vmatpush3.msra.mxu0 %v46_v12 }
  0x33   :  { %195 = vmatprep.subr.mxu0 %v285_v0 }
  0x34   :  { %196 = vmatpush3.msra.mxu0 %v45_v13 }
  0x35   :  { %197 = vmatprep.subr.mxu0 %v285_v0 }
  0x36   :  { %198 = vmatpush3.msra.mxu0 %v44_v14 }
  0x37   :  { %199 = vmatprep.subr.mxu0 %v285_v0 }
  0x38   :  { %200 = vmatpush3.msra.mxu0 %v43_v15 }
  0x39   :  { %201 = vmatprep.subr.mxu0 %v285_v0 }
  0x3a   :  { %202 = vmatpush3.msra.mxu0 %v42_v16 }
  0x3b   :  { %204 = vmatmul.mubr.f32.vlgmr.msra.gmra.mxu0 %v41_v17 }
  0xfb   :  { %v131_v19 = vpop.f32.mrf.mxu0 }
  0xfc   :  { %v132_v20 = vadd.f32 %v153_v18, %v131_v19 }
  0xfd   :  { %v205_v21 = vpop.f32.mrf.mxu0 }
  0xfe   :  { %213 = vtanh.f32 %v132_v20 }
 0x10b   :  { %v214_v22 = vpop.eup %213 }
 0x10c   :  { %136 = vst [vmem:[#allocation7] sm:$0xff] %v214_v22 }
 0x10d   :  { %266 = shalt.err (!%p263_p0)
}
 0x10e   :  { %146 = dma.vmem_to_hbm [thread:$0]  %s144_s25, 128, %s323_s3, [#allocation4]  }
 0x10f   :  { %279 = dma.done.wait [#allocation4], 128  }
 0x110   :  { %280 = vsyncadd [#allocation4], 4294967168 }
 0x111   :  { %150 = vsyncpa [#allocation3], 1 }
 0x112   :  { %151 = vsyncpa [#allocation6], 1 }
 0x113   :  { %152 = vsyncpa [#allocation4], 1 }

</bundles_post_ra>
